<compile_context>
chip_gen: v6e
topology: v6e:2x2x1
jax: 0.10.0
libtpu: 0.0.40
codegen_flags: <defaults>
</compile_context>

<pallas_src>
import functools

import jax
import jax.numpy as jnp
from jax.experimental import pallas as pl
from jax.experimental.pallas import tpu as pltpu

_LAYERS = ("fc1", "fc2", "fc3", "fc4", "fc5", "fc6")

_TB_MAX = 32768                     # large batch tile: amortize per-grid-step overhead
_VMEM_LIMIT = 40 * 1024 * 1024      # explicit scoped budget, v7x-safe (64 MiB / TC)


def _round_up(x, m):
    return ((x + m - 1) // m) * m


def _pick_tiles(batch, hidden_dim, tb_max):
    """Balanced, lane-aligned batch tiling with a VMEM-aware tile cap."""
    b_lane = _round_up(batch, 128)
    # Rough per-column VMEM: double-buffered (6->8,tb)+(2->8,tb) f32 I/O plus a few
    # live (max(16,H), tb) f32 intermediates.  Keep well under the scoped limit.
    per_col_bytes = 2 * (8 + 8) * 4 + 4 * max(16, hidden_dim) * 4
    cap = (2 * _VMEM_LIMIT // 3) // per_col_bytes
    tb_cap = max(128, min(tb_max, (cap // 128) * 128))
    n_tiles = -(-b_lane // tb_cap)
    if n_tiles > 1 and n_tiles % 2:
        n_tiles += 1                # even tile count -> balanced 2-TC split on v7x
    tb = _round_up(-(-b_lane // n_tiles), 128)
    return tb, n_tiles, n_tiles * tb


def _net_test_kernel(x_ref,
                     w1_ref, b1_ref, w2_ref, b2_ref, w3_ref, b3_ref,
                     w4_ref, b4_ref, w5_ref, b5_ref, w6_ref, b6_ref,
                     o_ref):
    """One batch tile of the fused MLP in (features, batch) = lane-dense layout."""
    mm = w1_ref.dtype               # bf16 on the streaming path, f32 otherwise

    def layer(h, w_ref, b_ref, relu=True):
        # MXU dot in mm dtype with f32 accumulation; bias-add / ReLU stay f32 (VPU-safe
        # on every generation).
        h = jnp.dot(w_ref[...], h.astype(mm),
                    preferred_element_type=jnp.float32) + b_ref[...]
        return jnp.maximum(h, 0.0) if relu else h

    h = x_ref[...]                                   # (6, TB), already in mm dtype

    # feature block
    h = layer(h, w1_ref, b1_ref)                     # (16, TB)
    h = layer(h, w2_ref, b2_ref)                     # (16, TB)
    h = layer(h, w3_ref, b3_ref)                     # (16, TB)

    # dence block -- Dropout(p=0.25) is identity at inference
    # TODO(synk): training-mode dropout not emitted.
    h = layer(h, w4_ref, b4_ref)                     # (H, TB)
    h = layer(h, w5_ref, b5_ref)                     # (H, TB)
    r = layer(h, w6_ref, b6_ref, relu=False)         # (2, TB)

    o_ref[...] = r.astype(o_ref.dtype)               # lane-dense (2, TB) store


@functools.partial(jax.jit, static_argnames=("use_bf16", "tb_max"))
def net_test_forward(props, params, *, use_bf16=True, tb_max=_TB_MAX):
    """props: (B, 6).  params: dict name -> (W, b), W in PyTorch (out, in) layout."""
    props = jnp.asarray(props, jnp.float32)
    B = props.shape[0]
    hidden_dim = params["fc5"][0].shape[0]
    tb, n_tiles, b_pad = _pick_tiles(B, hidden_dim, tb_max)

    in_dtype = jnp.bfloat16 if use_bf16 else jnp.float32

    # Single fused pad + transpose (+ bf16 cast) into batch-on-lanes layout (6, b_pad).
    # One DMA-speed XLA pass; with bf16 the written (and kernel-read) stream is halved.
    x_t = jnp.pad(props, ((0, b_pad - B), (0, 0))).T.astype(in_dtype)

    flat_params = []
    param_specs = []
    for name in _LAYERS:
        w, b = params[name]
        w = jnp.asarray(w, in_dtype)                       # bf16 weights: 1 MXU pass
        b_col = jnp.asarray(b, jnp.float32).reshape(-1, 1)  # f32 (out, 1) bias column
        flat_params += [w, b_col]
        # Full-array blocks with constant index_map -> VMEM-resident across the grid.
        param_specs += [
            pl.BlockSpec(w.shape, lambda i: (0, 0)),
            pl.BlockSpec(b_col.shape, lambda i: (0, 0)),
        ]

    out = pl.pallas_call(
        _net_test_kernel,
        out_shape=jax.ShapeDtypeStruct((2, b_pad), jnp.float32),
        grid=(n_tiles,),
        in_specs=[pl.BlockSpec((6, tb), lambda i: (0, i))] + param_specs,
        out_specs=pl.BlockSpec((2, tb), lambda i: (0, i)),
        compiler_params=pltpu.CompilerParams(
            dimension_semantics=("parallel",),            # megacore sharding on v7x
            vmem_limit_bytes=_VMEM_LIMIT,
        ),
    )(x_t, *flat_params)

    return out[:, :B].T                                   # slice, then transpose (B, 2)


def _init_linear(key, fan_in, fan_out):
    """Deterministic init mimicking PyTorch's default U(-1/sqrt(fan_in), ...)."""
    kw, kb = jax.random.split(key)
    bound = 1.0 / jnp.sqrt(float(fan_in))
    w = jax.random.uniform(kw, (fan_out, fan_in), jnp.float32, -bound, bound)
    b = jax.random.uniform(kb, (fan_out,), jnp.float32, -bound, bound)
    return w, b


def make_params(hidden_dim, key):
    keys = jax.random.split(key, 6)
    dims = [(6, 16), (16, 16), (16, 16),
            (16, hidden_dim), (hidden_dim, hidden_dim), (hidden_dim, 2)]
    return {n: _init_linear(k, fi, fo)
            for n, k, (fi, fo) in zip(_LAYERS, keys, dims)}


def _reference_forward(props, params, dot_dtype=jnp.float32):
    """Pure-JAX reference; dot_dtype=bf16 mirrors the kernel's streaming path."""
    h = jnp.asarray(props, jnp.float32)
    for i, name in enumerate(_LAYERS):
        w, b = params[name]                               # w is (out, in)
        h = jnp.dot(h.astype(dot_dtype), jnp.asarray(w, dot_dtype).T,
                    preferred_element_type=jnp.float32) + b
        if i < 5:                                          # ReLU after all but the last
            h = jnp.maximum(h, 0.0)
    return h


if __name__ == "__main__":
    key = jax.random.PRNGKey(0)
    k_params, k_x, k_big = jax.random.split(key, 3)

    hidden_dim = 32
    batch = 8

    params = make_params(hidden_dim, k_params)
    props = jax.random.normal(k_x, (batch, 6), jnp.float32)

    # 1) full-precision path vs f32 reference (tight tolerance)
    out_f32 = jax.block_until_ready(net_test_forward(props, params, use_bf16=False))
    ref_f32 = _reference_forward(props, params)
    assert out_f32.shape == (batch, 2)
    assert jnp.allclose(out_f32, ref_f32, atol=1e-5, rtol=1e-5)

    # 2) default bf16-streaming path vs a bf16-matmul reference
    out_bf16 = jax.block_until_ready(net_test_forward(props, params, use_bf16=True))
    ref_bf16 = _reference_forward(props, params, dot_dtype=jnp.bfloat16)
    assert out_bf16.shape == (batch, 2)
    assert jnp.allclose(out_bf16, ref_bf16, atol=2e-3, rtol=2e-3)
    assert jnp.allclose(out_bf16, ref_f32, atol=5e-2, rtol=5e-2)

    # 3) multi-tile grid path (small tb override so batch=300 spans 4 grid steps)
    props_big = jax.random.normal(k_big, (300, 6), jnp.float32)
    out_big = jax.block_until_ready(
        net_test_forward(props_big, params, use_bf16=False, tb_max=128))
    ref_big = _reference_forward(props_big, params)
    assert out_big.shape == (300, 2)
    assert jnp.allclose(out_big, ref_big, atol=1e-5, rtol=1e-5)

    print("KERNEL_OK")
</pallas_src>

<mosaic_0001>
module attributes {stable_mosaic.version = 11 : i64} {
  func.func @_net_test_kernel(%arg0: i32, %arg1: memref<6x128xf32, #tpu.memory_space<vmem>>, %arg2: memref<16x6xf32, #tpu.memory_space<vmem>>, %arg3: memref<16x1xf32, #tpu.memory_space<vmem>>, %arg4: memref<16x16xf32, #tpu.memory_space<vmem>>, %arg5: memref<16x1xf32, #tpu.memory_space<vmem>>, %arg6: memref<16x16xf32, #tpu.memory_space<vmem>>, %arg7: memref<16x1xf32, #tpu.memory_space<vmem>>, %arg8: memref<32x16xf32, #tpu.memory_space<vmem>>, %arg9: memref<32x1xf32, #tpu.memory_space<vmem>>, %arg10: memref<32x32xf32, #tpu.memory_space<vmem>>, %arg11: memref<32x1xf32, #tpu.memory_space<vmem>>, %arg12: memref<2x32xf32, #tpu.memory_space<vmem>>, %arg13: memref<2x1xf32, #tpu.memory_space<vmem>>, %arg14: memref<2x128xf32, #tpu.memory_space<vmem>>) attributes {dimension_semantics = [#tpu.dimension_semantics<parallel>], iteration_bounds = array<i64: 1>, scalar_prefetch = 0 : i64, scratch_operands = 0 : i64, tpu.core_type = #tpu.core_type<tc>, window_params = [{transform_indices = @transform_0, window_bounds = array<i64: 6, 128>}, {pipeline_mode = #tpu.pipeline_mode<synchronous>, transform_indices = @transform_1, window_bounds = array<i64: 16, 6>}, {pipeline_mode = #tpu.pipeline_mode<synchronous>, transform_indices = @transform_2, window_bounds = array<i64: 16, 1>}, {pipeline_mode = #tpu.pipeline_mode<synchronous>, transform_indices = @transform_3, window_bounds = array<i64: 16, 16>}, {pipeline_mode = #tpu.pipeline_mode<synchronous>, transform_indices = @transform_4, window_bounds = array<i64: 16, 1>}, {pipeline_mode = #tpu.pipeline_mode<synchronous>, transform_indices = @transform_5, window_bounds = array<i64: 16, 16>}, {pipeline_mode = #tpu.pipeline_mode<synchronous>, transform_indices = @transform_6, window_bounds = array<i64: 16, 1>}, {pipeline_mode = #tpu.pipeline_mode<synchronous>, transform_indices = @transform_7, window_bounds = array<i64: 32, 16>}, {pipeline_mode = #tpu.pipeline_mode<synchronous>, transform_indices = @transform_8, window_bounds = array<i64: 32, 1>}, {pipeline_mode = #tpu.pipeline_mode<synchronous>, transform_indices = @transform_9, window_bounds = array<i64: 32, 32>}, {pipeline_mode = #tpu.pipeline_mode<synchronous>, transform_indices = @transform_10, window_bounds = array<i64: 32, 1>}, {pipeline_mode = #tpu.pipeline_mode<synchronous>, transform_indices = @transform_11, window_bounds = array<i64: 2, 32>}, {pipeline_mode = #tpu.pipeline_mode<synchronous>, transform_indices = @transform_12, window_bounds = array<i64: 2, 1>}, {transform_indices = @transform_13, window_bounds = array<i64: 2, 128>}]} {
    %c0 = arith.constant 0 : index
    %c0_0 = arith.constant 0 : index
    %0 = vector.load %arg1[%c0, %c0_0] : memref<6x128xf32, #tpu.memory_space<vmem>>, vector<6x128xf32>
    %c0_1 = arith.constant 0 : index
    %c0_2 = arith.constant 0 : index
    %1 = vector.load %arg2[%c0_1, %c0_2] : memref<16x6xf32, #tpu.memory_space<vmem>>, vector<16x6xf32>
    %cst = arith.constant dense<0.000000e+00> : vector<16x128xf32>
    %2 = tpu.matmul %1, %0, %cst {dimension_numbers = #tpu.dot_dimension_numbers<[1], [0], [0], [1], [0, 0, 1, 1], [], []>} : vector<16x6xf32>, vector<6x128xf32>, vector<16x128xf32> -> vector<16x128xf32>
    %c0_3 = arith.constant 0 : index
    %c0_4 = arith.constant 0 : index
    %3 = vector.load %arg3[%c0_3, %c0_4] : memref<16x1xf32, #tpu.memory_space<vmem>>, vector<16x1xf32>
    %4 = vector.broadcast %3 : vector<16x1xf32> to vector<16x128xf32>
    %5 = arith.addf %2, %4 : vector<16x128xf32>
    %cst_5 = arith.constant 0.000000e+00 : f32
    %6 = vector.broadcast %cst_5 : f32 to vector<16x128xf32>
    %7 = arith.maximumf %5, %6 : vector<16x128xf32>
    %c0_6 = arith.constant 0 : index
    %c0_7 = arith.constant 0 : index
    %8 = vector.load %arg4[%c0_6, %c0_7] : memref<16x16xf32, #tpu.memory_space<vmem>>, vector<16x16xf32>
    %cst_8 = arith.constant dense<0.000000e+00> : vector<16x128xf32>
    %9 = tpu.matmul %8, %7, %cst_8 {dimension_numbers = #tpu.dot_dimension_numbers<[1], [0], [0], [1], [0, 0, 1, 1], [], []>} : vector<16x16xf32>, vector<16x128xf32>, vector<16x128xf32> -> vector<16x128xf32>
    %c0_9 = arith.constant 0 : index
    %c0_10 = arith.constant 0 : index
    %10 = vector.load %arg5[%c0_9, %c0_10] : memref<16x1xf32, #tpu.memory_space<vmem>>, vector<16x1xf32>
    %11 = vector.broadcast %10 : vector<16x1xf32> to vector<16x128xf32>
    %12 = arith.addf %9, %11 : vector<16x128xf32>
    %cst_11 = arith.constant 0.000000e+00 : f32
    %13 = vector.broadcast %cst_11 : f32 to vector<16x128xf32>
    %14 = arith.maximumf %12, %13 : vector<16x128xf32>
    %c0_12 = arith.constant 0 : index
    %c0_13 = arith.constant 0 : index
    %15 = vector.load %arg6[%c0_12, %c0_13] : memref<16x16xf32, #tpu.memory_space<vmem>>, vector<16x16xf32>
    %cst_14 = arith.constant dense<0.000000e+00> : vector<16x128xf32>
    %16 = tpu.matmul %15, %14, %cst_14 {dimension_numbers = #tpu.dot_dimension_numbers<[1], [0], [0], [1], [0, 0, 1, 1], [], []>} : vector<16x16xf32>, vector<16x128xf32>, vector<16x128xf32> -> vector<16x128xf32>
    %c0_15 = arith.constant 0 : index
    %c0_16 = arith.constant 0 : index
    %17 = vector.load %arg7[%c0_15, %c0_16] : memref<16x1xf32, #tpu.memory_space<vmem>>, vector<16x1xf32>
    %18 = vector.broadcast %17 : vector<16x1xf32> to vector<16x128xf32>
    %19 = arith.addf %16, %18 : vector<16x128xf32>
    %cst_17 = arith.constant 0.000000e+00 : f32
    %20 = vector.broadcast %cst_17 : f32 to vector<16x128xf32>
    %21 = arith.maximumf %19, %20 : vector<16x128xf32>
    %c0_18 = arith.constant 0 : index
    %c0_19 = arith.constant 0 : index
    %22 = vector.load %arg8[%c0_18, %c0_19] : memref<32x16xf32, #tpu.memory_space<vmem>>, vector<32x16xf32>
    %cst_20 = arith.constant dense<0.000000e+00> : vector<32x128xf32>
    %23 = tpu.matmul %22, %21, %cst_20 {dimension_numbers = #tpu.dot_dimension_numbers<[1], [0], [0], [1], [0, 0, 1, 1], [], []>} : vector<32x16xf32>, vector<16x128xf32>, vector<32x128xf32> -> vector<32x128xf32>
    %c0_21 = arith.constant 0 : index
    %c0_22 = arith.constant 0 : index
    %24 = vector.load %arg9[%c0_21, %c0_22] : memref<32x1xf32, #tpu.memory_space<vmem>>, vector<32x1xf32>
    %25 = vector.broadcast %24 : vector<32x1xf32> to vector<32x128xf32>
    %26 = arith.addf %23, %25 : vector<32x128xf32>
    %cst_23 = arith.constant 0.000000e+00 : f32
    %27 = vector.broadcast %cst_23 : f32 to vector<32x128xf32>
    %28 = arith.maximumf %26, %27 : vector<32x128xf32>
    %c0_24 = arith.constant 0 : index
    %c0_25 = arith.constant 0 : index
    %29 = vector.load %arg10[%c0_24, %c0_25] : memref<32x32xf32, #tpu.memory_space<vmem>>, vector<32x32xf32>
    %cst_26 = arith.constant dense<0.000000e+00> : vector<32x128xf32>
    %30 = tpu.matmul %29, %28, %cst_26 {dimension_numbers = #tpu.dot_dimension_numbers<[1], [0], [0], [1], [0, 0, 1, 1], [], []>} : vector<32x32xf32>, vector<32x128xf32>, vector<32x128xf32> -> vector<32x128xf32>
    %c0_27 = arith.constant 0 : index
    %c0_28 = arith.constant 0 : index
    %31 = vector.load %arg11[%c0_27, %c0_28] : memref<32x1xf32, #tpu.memory_space<vmem>>, vector<32x1xf32>
    %32 = vector.broadcast %31 : vector<32x1xf32> to vector<32x128xf32>
    %33 = arith.addf %30, %32 : vector<32x128xf32>
    %cst_29 = arith.constant 0.000000e+00 : f32
    %34 = vector.broadcast %cst_29 : f32 to vector<32x128xf32>
    %35 = arith.maximumf %33, %34 : vector<32x128xf32>
    %c0_30 = arith.constant 0 : index
    %c0_31 = arith.constant 0 : index
    %36 = vector.load %arg12[%c0_30, %c0_31] : memref<2x32xf32, #tpu.memory_space<vmem>>, vector<2x32xf32>
    %cst_32 = arith.constant dense<0.000000e+00> : vector<2x128xf32>
    %37 = tpu.matmul %36, %35, %cst_32 {dimension_numbers = #tpu.dot_dimension_numbers<[1], [0], [0], [1], [0, 0, 1, 1], [], []>} : vector<2x32xf32>, vector<32x128xf32>, vector<2x128xf32> -> vector<2x128xf32>
    %c0_33 = arith.constant 0 : index
    %c0_34 = arith.constant 0 : index
    %38 = vector.load %arg13[%c0_33, %c0_34] : memref<2x1xf32, #tpu.memory_space<vmem>>, vector<2x1xf32>
    %39 = vector.broadcast %38 : vector<2x1xf32> to vector<2x128xf32>
    %40 = arith.addf %37, %39 : vector<2x128xf32>
    %c0_35 = arith.constant 0 : index
    %c0_36 = arith.constant 0 : index
    %41 = vector.load %arg14[%c0_35, %c0_36] : memref<2x128xf32, #tpu.memory_space<vmem>>, vector<2x128xf32>
    tpu.vector_store %arg14[%c0_35, %c0_36], %40 {strides = array<i32>} : memref<2x128xf32, #tpu.memory_space<vmem>>, vector<2x128xf32>,
    return
  }
  func.func @transform_0(%arg0: i32) -> (i32, i32) {
    %c0_i32 = arith.constant 0 : i32
    %c0_i32_0 = arith.constant 0 : i32
    return %c0_i32, %arg0 : i32, i32
  }
  func.func @transform_1(%arg0: i32) -> (i32, i32) {
    %c0_i32 = arith.constant 0 : i32
    %c0_i32_0 = arith.constant 0 : i32
    %c0_i32_1 = arith.constant 0 : i32
    return %c0_i32, %c0_i32_0 : i32, i32
  }
  func.func @transform_2(%arg0: i32) -> (i32, i32) {
    %c0_i32 = arith.constant 0 : i32
    %c0_i32_0 = arith.constant 0 : i32
    %c0_i32_1 = arith.constant 0 : i32
    return %c0_i32, %c0_i32_0 : i32, i32
  }
  func.func @transform_3(%arg0: i32) -> (i32, i32) {
    %c0_i32 = arith.constant 0 : i32
    %c0_i32_0 = arith.constant 0 : i32
    %c0_i32_1 = arith.constant 0 : i32
    return %c0_i32, %c0_i32_0 : i32, i32
  }
  func.func @transform_4(%arg0: i32) -> (i32, i32) {
    %c0_i32 = arith.constant 0 : i32
    %c0_i32_0 = arith.constant 0 : i32
    %c0_i32_1 = arith.constant 0 : i32
    return %c0_i32, %c0_i32_0 : i32, i32
  }
  func.func @transform_5(%arg0: i32) -> (i32, i32) {
    %c0_i32 = arith.constant 0 : i32
    %c0_i32_0 = arith.constant 0 : i32
    %c0_i32_1 = arith.constant 0 : i32
    return %c0_i32, %c0_i32_0 : i32, i32
  }
  func.func @transform_6(%arg0: i32) -> (i32, i32) {
    %c0_i32 = arith.constant 0 : i32
    %c0_i32_0 = arith.constant 0 : i32
    %c0_i32_1 = arith.constant 0 : i32
    return %c0_i32, %c0_i32_0 : i32, i32
  }
  func.func @transform_7(%arg0: i32) -> (i32, i32) {
    %c0_i32 = arith.constant 0 : i32
    %c0_i32_0 = arith.constant 0 : i32
    %c0_i32_1 = arith.constant 0 : i32
    return %c0_i32, %c0_i32_0 : i32, i32
  }
  func.func @transform_8(%arg0: i32) -> (i32, i32) {
    %c0_i32 = arith.constant 0 : i32
    %c0_i32_0 = arith.constant 0 : i32
    %c0_i32_1 = arith.constant 0 : i32
    return %c0_i32, %c0_i32_0 : i32, i32
  }
  func.func @transform_9(%arg0: i32) -> (i32, i32) {
    %c0_i32 = arith.constant 0 : i32
    %c0_i32_0 = arith.constant 0 : i32
    %c0_i32_1 = arith.constant 0 : i32
    return %c0_i32, %c0_i32_0 : i32, i32
  }
  func.func @transform_10(%arg0: i32) -> (i32, i32) {
    %c0_i32 = arith.constant 0 : i32
    %c0_i32_0 = arith.constant 0 : i32
    %c0_i32_1 = arith.constant 0 : i32
    return %c0_i32, %c0_i32_0 : i32, i32
  }
  func.func @transform_11(%arg0: i32) -> (i32, i32) {
    %c0_i32 = arith.constant 0 : i32
    %c0_i32_0 = arith.constant 0 : i32
    %c0_i32_1 = arith.constant 0 : i32
    return %c0_i32, %c0_i32_0 : i32, i32
  }
  func.func @transform_12(%arg0: i32) -> (i32, i32) {
    %c0_i32 = arith.constant 0 : i32
    %c0_i32_0 = arith.constant 0 : i32
    %c0_i32_1 = arith.constant 0 : i32
    return %c0_i32, %c0_i32_0 : i32, i32
  }
  func.func @transform_13(%arg0: i32) -> (i32, i32) {
    %c0_i32 = arith.constant 0 : i32
    %c0_i32_0 = arith.constant 0 : i32
    return %c0_i32, %arg0 : i32, i32
  }
}

</mosaic_0001>

<bundles_post_ra>
// kernel: net_test_forward.1
= control target key start
LH: loop header
LB: loop body
LE: loop exit
PB: predicated region body
PF: predicated region fallthrough
CT: control target
= control target key end

     0   :  { %vm66_vm0 = vcmask 1045504   ;;  %vm59_vm1 = vcmask 48128   ;;  %v791_v3 = vmov 0   ;;  %vm161_vm2 = vcmask 130048   ;;  %s973_s0 = inlined_call_operand.vmem [shape: f32[6,128], index: 0, kind: input, shape index: {}]   ;;  %s974_s1 = inlined_call_operand.vmem [shape: f32[16,6], index: 1, kind: input, shape index: {}]   ;;  %s975_s2 = inlined_call_operand.vmem [shape: f32[16,1], index: 2, kind: input, shape index: {}]   ;;  %s976_s6 = inlined_call_operand.vmem [shape: f32[16,1], index: 6, kind: input, shape index: {}]   ;;  %s977_s8 = inlined_call_operand.vmem [shape: f32[32,1], index: 8, kind: input, shape index: {}]   ;;  %s978_s10 = inlined_call_operand.vmem [shape: f32[32,1], index: 10, kind: input, shape index: {}]   ;;  %s979_s12 = inlined_call_operand.vmem [shape: f32[2,1], index: 12, kind: input, shape index: {}]   ;;  %s980_s3 = inlined_call_operand.vmem [shape: f32[16,16], index: 3, kind: input, shape index: {}]   ;;  %s981_s4 = inlined_call_operand.vmem [shape: f32[16,1], index: 4, kind: input, shape index: {}]   ;;  %s982_s5 = inlined_call_operand.vmem [shape: f32[16,16], index: 5, kind: input, shape index: {}]   ;;  %s983_s7 = inlined_call_operand.vmem [shape: f32[32,16], index: 7, kind: input, shape index: {}]   ;;  %s984_s9 = inlined_call_operand.vmem [shape: f32[32,32], index: 9, kind: input, shape index: {}]   ;;  %s985_s11 = inlined_call_operand.vmem [shape: f32[2,32], index: 11, kind: input, shape index: {}]   ;;  %s986_s13 = inlined_call_operand.vmem [shape: f32[2,128], index: 13, kind: output, shape index: {}]  }
   0x1   :  { %v44_v0 = vld [vmem:[%s973_s0] sm:$0x3f]  ;;  %v46_v2 = vld [vmem:[%s974_s1 + $0x8] sm:$0xff]  ;;  %789 = vset.pattern.permute.xlu0 %v791_v3  ;;  %790 = vset.pattern.permute.xlu1 %v791_v3  ;;  %v349_v7 = vld [vmem:[%s977_s8 + $0x18] sm:$0xff]  ;;  %vm499_vm3 = vcmask 261120   ;;  %vm793_vm4 = vmmov 0  }
   0x2   :  { %v45_v1 = vld [vmem:[%s974_s1] sm:$0xff]  ;;  %732 = vmatprep.subr.msk.mxu0 %vm66_vm0, %v44_v0  ;;  %v48_v4 = vld [vmem:[%s975_s2 + $0x8] sm:$0xff]  ;;  %v478_v9 = vld [vmem:[%s978_s10 + $0x18] sm:$0xff] }
   0x3   :  { %734 = vmatprep.mubr.msk.f32.mxu0 %vm59_vm1, %v45_v1  ;;  %733 = vmatpush3.msk.msra.mxu0 %vm66_vm0, %v44_v0  ;;  %v47_v5 = vld [vmem:[%s975_s2] sm:$0xff]  ;;  %v248_v6 = vld [vmem:[%s976_s6 + $0x8] sm:$0xff]  ;;  %v348_v16 = vld [vmem:[%s977_s8 + $0x10] sm:$0xff] }
   0x4   :  { %56 = vperm.xlu0 %789, %v48_v4   ;;  %735 = vmatmul.mubr.msk.f32.vlgmr.msra.gmra.mxu0 %vm59_vm1, %v46_v2  ;;  %v347_v8 = vld [vmem:[%s977_s8 + $0x8] sm:$0xff]  ;;  %v602_v11 = vld [vmem:[%s979_s12] sm:$0x3]  ;;  %v477_v18 = vld [vmem:[%s978_s10 + $0x10] sm:$0xff] }
   0x5   :  { %v476_v10 = vld [vmem:[%s978_s10 + $0x8] sm:$0xff]  ;;  %v147_v12 = vld [vmem:[%s980_s3] sm:$0xff]  ;;  %v344_v49 = vld [vmem:[%s983_s7 + $0x10] sm:$0xff] }
   0x6   :  { %741 = vmatprep.mubr.msk.f32.mxu1 %vm161_vm2, %v147_v12  ;;  %v150_v13 = vld [vmem:[%s981_s4 + $0x8] sm:$0xff]  ;;  %v149_v14 = vld [vmem:[%s981_s4] sm:$0xff]  ;;  %v345_v50 = vld [vmem:[%s983_s7 + $0x18] sm:$0xff] }
   0x7   :  { %158 = vperm.xlu1 %790, %v150_v13   ;;  %v247_v15 = vld [vmem:[%s976_s6] sm:$0xff]  ;;  %v148_v28 = vld [vmem:[%s980_s3 + $0x8] sm:$0xff] }
   0x8   :  { %51 = vperm.xlu0 %789, %v47_v5   ;;  %v346_v17 = vld [vmem:[%s977_s8] sm:$0xff]  ;;  %v246_v38 = vld [vmem:[%s982_s5 + $0x8] sm:$0xff]  ;;  %v473_v5 = vld [vmem:[%s984_s9 + $0x10] sm:$0xff] }
   0x9   :  { %v475_v19 = vld [vmem:[%s978_s10] sm:$0xff]  ;;  %v343_v48 = vld [vmem:[%s983_s7 + $0x8] sm:$0xff] }
   0xa   :  { %v245_v29 = vld [vmem:[%s982_s5] sm:$0xff]  ;;  %v472_v4 = vld [vmem:[%s984_s9 + $0x8] sm:$0xff] }
   0xb   :  { %153 = vperm.xlu1 %790, %v149_v14   ;;  %748 = vmatprep.mubr.msk.f32.mxu0 %vm161_vm2, %v245_v29  ;;  %v342_v39 = vld [vmem:[%s983_s7] sm:$0xff] }
   0xc   :  { %256 = vperm.xlu0 %789, %v248_v6   ;;  %v471_v51 = vld [vmem:[%s984_s9] sm:$0xff]  ;;  %v474_v6 = vld [vmem:[%s984_s9 + $0x18] sm:$0xff] }
   0xf   :  { %251 = vperm.xlu1 %790, %v247_v15  }
  0x10   :  { %367 = vperm.xlu0 %789, %v349_v7   ;;  %v792_v7 = vmov 0.0  }
  0x13   :  { %362 = vperm.xlu1 %790, %v348_v16  }
  0x14   :  { %357 = vperm.xlu0 %789, %v347_v8  }
  0x17   :  { %352 = vperm.xlu1 %790, %v346_v17  }
  0x18   :  { %496 = vperm.xlu0 %789, %v478_v9  }
  0x1b   :  { %491 = vperm.xlu1 %790, %v477_v18  }
  0x1c   :  { %486 = vperm.xlu0 %789, %v476_v10  }
  0x1f   :  { %481 = vperm.xlu1 %790, %v475_v19  }
  0x20   :  { %605 = vperm.xlu0 %789, %v602_v11  }
  0x7f   :  { %v57_v20 = vpop.permute.xlu0 %56 }
  0x82   :  { %v159_v30 = vpop.permute.xlu1 %158 }
  0x83   :  { %v52_v23 = vpop.permute.xlu0 %51 }
  0x86   :  { %v154_v33 = vpop.permute.xlu1 %153 }
  0x87   :  { %v257_v40 = vpop.permute.xlu0 %256 }
  0x8a   :  { %v252_v43 = vpop.permute.xlu1 %251 }
  0x8b   :  { %v368_v52 = vpop.permute.xlu0 %367 }
  0x8e   :  { %v363_v54 = vpop.permute.xlu1 %362 }
  0x8f   :  { %v358_v58 = vpop.permute.xlu0 %357 }
  0x92   :  { %v353_v63 = vpop.permute.xlu1 %352 }
  0x93   :  { %v497_v8 = vpop.permute.xlu0 %496 }
  0x96   :  { %v492_v10 = vpop.permute.xlu1 %491 }
  0x97   :  { %v487_v14 = vpop.permute.xlu0 %486 }
  0x9a   :  { %v482_v19 = vpop.permute.xlu1 %481 }
  0xc4   :  { %v736_v21 = vpop.f32.mrf.mxu0 }
  0xc5   :  { %v142_v22 = vadd.f32 %v736_v21, %v57_v20 }
  0xc6   :  { %v136_v24 = vpop.f32.mrf.mxu0 }
  0xc7   :  { %v146_v25 = vmax.f32 %v142_v22, 0.0  ;;  %v137_v26 = vadd.f32 %v136_v24, %v52_v23  ;;  %v601_v24 = vld [vmem:[%s985_s11] sm:$0x3] }
  0xc9   :  { %v145_v27 = vmax.f32 %v137_v26, 0.0  ;;  %737 = vmatprep.subr.mxu1 %v146_v25 }
  0xca   :  { %738 = vmatpush3.msra.mxu1 %v146_v25  ;;  %v606_v25 = vpop.permute.xlu0 %605 }
  0xcb   :  { %739 = vmatprep.subr.mxu1 %v145_v27 }
  0xcc   :  { %740 = vmatpush3.msra.mxu1 %v145_v27 }
  0xcd   :  { %742 = vmatmul.mubr.msk.f32.vlgmr.msra.gmra.mxu1 %vm161_vm2, %v148_v28 }
  0xce   :  { %755 = vmatprep.mubr.msk.f32.mxu1 %vm161_vm2, %v342_v39 }
 0x18d   :  { %v743_v31 = vpop.f32.mrf.mxu1 }
 0x18e   :  { %v240_v32 = vadd.f32 %v743_v31, %v159_v30 }
 0x18f   :  { %v234_v34 = vpop.f32.mrf.mxu1 }
 0x190   :  { %v244_v35 = vmax.f32 %v240_v32, 0.0  ;;  %v235_v36 = vadd.f32 %v234_v34, %v154_v33 }
 0x192   :  { %v243_v37 = vmax.f32 %v235_v36, 0.0  ;;  %744 = vmatprep.subr.mxu0 %v244_v35 }
 0x193   :  { %745 = vmatpush3.msra.mxu0 %v244_v35 }
 0x194   :  { %746 = vmatprep.subr.mxu0 %v243_v37 }
 0x195   :  { %747 = vmatpush3.msra.mxu0 %v243_v37 }
 0x196   :  { %749 = vmatmul.mubr.msk.f32.vlgmr.msra.gmra.mxu0 %vm161_vm2, %v246_v38 }
 0x197   :  { %769 = vmatprep.mubr.msk.f32.mxu0 %vm499_vm3, %v471_v51 }
 0x256   :  { %v750_v41 = vpop.f32.mrf.mxu0 }
 0x257   :  { %v337_v42 = vadd.f32 %v750_v41, %v257_v40 }
 0x258   :  { %v331_v44 = vpop.f32.mrf.mxu0 }
 0x259   :  { %v341_v45 = vmax.f32 %v337_v42, 0.0  ;;  %v332_v46 = vadd.f32 %v331_v44, %v252_v43 }
 0x25b   :  { %v340_v47 = vmax.f32 %v332_v46, 0.0  ;;  %751 = vmatprep.subr.mxu1 %v341_v45 }
 0x25c   :  { %752 = vmatpush3.msra.mxu1 %v341_v45 }
 0x25d   :  { %753 = vmatprep.subr.mxu1 %v340_v47 }
 0x25e   :  { %754 = vmatpush3.msra.mxu1 %v340_v47 }
 0x25f   :  { %756 = vmatmul.mubr.msk.f32.vlgmr.msra.gmra.mxu1 %vm161_vm2, %v343_v48  ;;  %775 = vmatprep.subr.mxu1 %v792_v7 }
 0x260   :  { %758 = vmatprep.mubr.msk.f32.mxu1 %vm161_vm2, %v344_v49 }
 0x263   :  { %759 = vmatmul.mubr.msk.f32.gmra.mxu1 %vm161_vm2, %v345_v50 }
 0x264   :  { %783 = vmatprep.mubr.msk.f32.mxu1 %vm793_vm4, %v792_v7 }
 0x31f   :  { %v757_v53 = vpop.f32.mrf.mxu1 }
 0x320   :  { %v454_v60 = vadd.f32 %v757_v53, %v358_v58 }
 0x321   :  { %v448_v55 = vpop.f32.mrf.mxu1 }
 0x322   :  { %v449_v0 = vadd.f32 %v448_v55, %v353_v63  ;;  %v468_v2 = vmax.f32 %v454_v60, 0.0 }
 0x323   :  { %v760_v56 = vpop.f32.mrf.mxu1 }
 0x324   :  { %v464_v57 = vadd.f32 %v760_v56, %v368_v52  ;;  %v467_v3 = vmax.f32 %v449_v0, 0.0 }
 0x325   :  { %v458_v59 = vpop.f32.mrf.mxu1 }
 0x326   :  { %v470_v61 = vmax.f32 %v464_v57, 0.0  ;;  %v459_v62 = vadd.f32 %v458_v59, %v363_v54 }
 0x328   :  { %v469_v1 = vmax.f32 %v459_v62, 0.0  ;;  %761 = vmatprep.subr.mxu0 %v470_v61 }
 0x329   :  { %762 = vmatpush3.msra.mxu0 %v470_v61 }
 0x32a   :  { %763 = vmatprep.subr.mxu0 %v469_v1 }
 0x32b   :  { %764 = vmatpush3.msra.mxu0 %v469_v1 }
 0x32c   :  { %765 = vmatprep.subr.mxu0 %v468_v2 }
 0x32d   :  { %766 = vmatpush3.msra.mxu0 %v468_v2 }
 0x32e   :  { %767 = vmatprep.subr.mxu0 %v467_v3 }
 0x32f   :  { %768 = vmatpush3.msra.mxu0 %v467_v3 }
 0x330   :  { %770 = vmatmul.mubr.msk.f32.vlgmr.msra.gmra.mxu0 %vm499_vm3, %v472_v4 }
 0x331   :  { %772 = vmatprep.mubr.msk.f32.mxu0 %vm499_vm3, %v473_v5 }
 0x334   :  { %773 = vmatmul.mubr.msk.f32.gmra.mxu0 %vm499_vm3, %v474_v6 }
 0x3f0   :  { %v771_v9 = vpop.f32.mrf.mxu0 }
 0x3f1   :  { %v584_v16 = vadd.f32 %v771_v9, %v487_v14 }
 0x3f2   :  { %v578_v11 = vpop.f32.mrf.mxu0 }
 0x3f3   :  { %v579_v20 = vadd.f32 %v578_v11, %v482_v19  ;;  %v598_v22 = vmax.f32 %v584_v16, 0.0 }
 0x3f4   :  { %v774_v12 = vpop.f32.mrf.mxu0 }
 0x3f5   :  { %v594_v13 = vadd.f32 %v774_v12, %v497_v8  ;;  %v597_v23 = vmax.f32 %v579_v20, 0.0 }
 0x3f6   :  { %v588_v15 = vpop.f32.mrf.mxu0 }
 0x3f7   :  { %v600_v17 = vmax.f32 %v594_v13, 0.0  ;;  %v589_v18 = vadd.f32 %v588_v15, %v492_v10 }
 0x3f9   :  { %v599_v21 = vmax.f32 %v589_v18, 0.0  ;;  %776 = vmatpush3.msra.mxu1 %v600_v17 }
 0x3fa   :  { %777 = vmatprep.subr.mxu1 %v792_v7 }
 0x3fb   :  { %778 = vmatpush3.msra.mxu1 %v599_v21 }
 0x3fc   :  { %779 = vmatprep.subr.mxu1 %v792_v7 }
 0x3fd   :  { %780 = vmatpush3.msra.mxu1 %v598_v22 }
 0x3fe   :  { %781 = vmatprep.subr.mxu1 %v792_v7 }
 0x3ff   :  { %782 = vmatpush3.msra.mxu1 %v597_v23 }
 0x400   :  { %784 = vmatmul.mubr.msk.f32.vlgmr.msra.gmra.mxu1 %vm499_vm3, %v601_v24 }
 0x4c0   :  { %v677_v26 = vpop.f32.mrf.mxu1 }
 0x4c1   :  { %v678_v27 = vadd.f32 %v677_v26, %v606_v25 }
 0x4c2   :  { %v785_v28 = vpop.f32.mrf.mxu1 }
 0x4c3   :  { %681 = vst [vmem:[%s986_s13] sm:$0x3] %v678_v27 }

</bundles_post_ra>
